<compile_context>
chip_gen: v7x
topology: tpu7x:2x2x1
jax: 0.10.0
libtpu: 0.0.40
codegen_flags: <defaults>
</compile_context>

<pallas_src>
import functools

import jax
import jax.numpy as jnp
from jax.experimental import pallas as pl
from jax.experimental.pallas import tpu as pltpu


def _threshold_i31(block_size, drop_prob):
    gamma = float(drop_prob) / float(block_size) ** 2
    return min(int(round(gamma * (1 << 31))), (1 << 31) - 1)


def _random_bits_i31(key, shape):
    """Uniform 31-bit random integers in [0, 2**31) as int32."""
    bits = jax.random.bits(key, shape, dtype=jnp.uint32)
    return jax.lax.shift_right_logical(bits, jnp.uint32(1)).astype(jnp.int32)


def _shift_flat(a, s):
    """a shifted by s along the last axis with zero fill: out[..., i] = a[..., i+s]."""
    n = a.shape[-1]
    if s == 0:
        return a
    if abs(s) >= n:
        return jnp.zeros_like(a)
    z = jnp.zeros(a.shape[:-1] + (abs(s),), a.dtype)
    if s > 0:
        return jnp.concatenate([a[..., s:], z], axis=-1)
    return jnp.concatenate([z, a[..., : n + s]], axis=-1)


def _dropblock_kernel(x_ref, bits_ref, o_ref, *, block_size, thr_i31, H, W):
    pad = block_size // 2
    HW = H * W

    x = x_ref[...]                       # (1, Ct, H*W)
    bits = bits_ref[...]                 # (1, Ct, H*W) int32 in [0, 2**31)

    # Bernoulli(gamma) via integer-threshold compare -> {0, 1} int32.
    m = (bits < jnp.int32(thr_i31)).astype(jnp.int32)

    # --- separable max-pool(kernel=block_size, stride=1, pad=block_size//2) ---
    # Vertical pass: shifts by whole rows (dy * W). Zero fill on the flat axis
    # is exactly the zero padding at the top/bottom image boundary.
    vm = m
    for dy in range(-pad, block_size - pad):
        if dy != 0:
            vm = vm | _shift_flat(m, dy * W)

    # Horizontal pass: shifts by dx with a 1-D column-validity mask so values
    # cannot wrap across row boundaries of the flattened axis.
    col = jax.lax.broadcasted_iota(jnp.int32, (1, 1, HW), dimension=2) % W
    bm = vm
    for dx in range(-pad, block_size - pad):
        if dx == 0:
            continue
        if dx > 0:
            valid = (col < (W - dx)).astype(jnp.int32)
        else:
            valid = (col >= (-dx)).astype(jnp.int32)
        bm = bm | (_shift_flat(vm, dx) & valid)

    # out = x * (1 - block_mask) with block_mask in {0, 1}  ==  a single select.
    o_ref[...] = jnp.where(bm != 0, jnp.zeros((), x.dtype), x).astype(o_ref.dtype)


def _pick_c_tile(C, HW, x_bytes):
    """Largest channel tile whose pipelined working set stays well inside VMEM."""
    # 2 pipeline buffers each for x, bits and out, plus ~4 full-size i32 temps.
    per_chan = HW * (2 * (2 * x_bytes + 4) + 4 * 4)
    budget = 24 * 1024 * 1024
    if C * per_chan <= budget:
        return C
    best = 0
    ct = 8
    while ct < C:                        # tiles != C must be sublane-aligned (x8)
        if C % ct == 0 and ct * per_chan <= budget:
            best = ct
        ct += 8
    return best if best > 0 else C


def dropblock2d(x, key, *, block_size, drop_prob, training=True):
    """DropBlock2d forward. x: (N, C, H, W). Odd block_size (same requirement as
    the PyTorch module for max_pool2d shape compatibility)."""
    if (not training) or drop_prob == 0:
        return x
    assert block_size % 2 == 1, "block_size must be odd"

    N, C, H, W = x.shape
    HW = H * W
    thr = _threshold_i31(block_size, drop_prob)

    bits = _random_bits_i31(key, (N, C, HW))
    x_flat = x.reshape(N, C, HW)         # lane-dense layout: last axis = H*W

    Ct = _pick_c_tile(C, HW, jnp.dtype(x.dtype).itemsize)

    kernel = functools.partial(
        _dropblock_kernel, block_size=block_size, thr_i31=thr, H=H, W=W
    )
    out_flat = pl.pallas_call(
        kernel,
        out_shape=jax.ShapeDtypeStruct((N, C, HW), x.dtype),
        grid_spec=pltpu.PrefetchScalarGridSpec(
            num_scalar_prefetch=0,
            grid=(N, C // Ct),
            in_specs=[
                pl.BlockSpec((1, Ct, HW), lambda n, c: (n, c, 0)),
                pl.BlockSpec((1, Ct, HW), lambda n, c: (n, c, 0)),
            ],
            out_specs=pl.BlockSpec((1, Ct, HW), lambda n, c: (n, c, 0)),
        ),
        compiler_params=pltpu.CompilerParams(
            dimension_semantics=("parallel", "parallel"),
            vmem_limit_bytes=64 * 1024 * 1024,
        ),
    )(x_flat, bits)
    return out_flat.reshape(N, C, H, W)


def _dropblock_reference(x, bits_i31, block_size, drop_prob):
    """Pure-JAX reference consuming the same random bits (mirrors the PyTorch module)."""
    N, C, H, W = x.shape
    thr = _threshold_i31(block_size, drop_prob)
    m = (bits_i31.reshape(N, C, H, W) < thr).astype(jnp.float32)
    pad = block_size // 2
    bm = jax.lax.reduce_window(
        m, -jnp.inf, jax.lax.max,
        window_dimensions=(1, 1, block_size, block_size),
        window_strides=(1, 1, 1, 1),
        padding=[(0, 0), (0, 0), (pad, pad), (pad, pad)],
    )
    return (x * (1.0 - bm)).astype(x.dtype)


if __name__ == "__main__":
    # DropBlock2d(block_size=3, drop_prob=0.3), training mode.
    block_size = 3
    drop_prob = 0.3

    root = jax.random.PRNGKey(0)
    xkey, dkey = jax.random.split(root)
    x = jax.random.normal(xkey, (2, 4, 16, 16), dtype=jnp.float32)

    out = dropblock2d(x, dkey, block_size=block_size, drop_prob=drop_prob,
                      training=True)
    out = jax.block_until_ready(out)

    # Shape / dtype preserved; every element is either kept (== x) or dropped (== 0).
    assert out.shape == x.shape and out.dtype == x.dtype
    assert bool(jnp.all((out == x) | (out == 0.0)))

    # Exact match against a pure-JAX reference that consumes the same random bits.
    ref = _dropblock_reference(
        x, _random_bits_i31(dkey, (2, 4, 16 * 16)), block_size, drop_prob
    )
    assert bool(jnp.all(out == ref))

    # Eval mode / drop_prob == 0 is identity, like the PyTorch module.
    out_eval = dropblock2d(x, dkey, block_size=block_size, drop_prob=drop_prob,
                           training=False)
    assert bool(jnp.all(out_eval == x))

    print("KERNEL_OK")
</pallas_src>

<mosaic_0001>
module attributes {stable_mosaic.version = 11 : i64} {
  func.func @_dropblock_kernel(%arg0: i32, %arg1: i32, %arg2: memref<1x4x256xf32, #tpu.memory_space<vmem>>, %arg3: memref<1x4x256xi32, #tpu.memory_space<vmem>>, %arg4: memref<1x4x256xf32, #tpu.memory_space<vmem>>) attributes {dimension_semantics = [#tpu.dimension_semantics<parallel>, #tpu.dimension_semantics<parallel>], iteration_bounds = array<i64: 2, 1>, scalar_prefetch = 0 : i64, scratch_operands = 0 : i64, tpu.core_type = #tpu.core_type<tc>, window_params = [{transform_indices = @transform_0, window_bounds = array<i64: 1, 4, 256>}, {transform_indices = @transform_1, window_bounds = array<i64: 1, 4, 256>}, {transform_indices = @transform_2, window_bounds = array<i64: 1, 4, 256>}]} {
    %c0 = arith.constant 0 : index
    %c0_0 = arith.constant 0 : index
    %c0_1 = arith.constant 0 : index
    %0 = vector.load %arg2[%c0, %c0_0, %c0_1] : memref<1x4x256xf32, #tpu.memory_space<vmem>>, vector<1x4x256xf32>
    %c0_2 = arith.constant 0 : index
    %c0_3 = arith.constant 0 : index
    %c0_4 = arith.constant 0 : index
    %1 = vector.load %arg3[%c0_2, %c0_3, %c0_4] : memref<1x4x256xi32, #tpu.memory_space<vmem>>, vector<1x4x256xi32>
    %c71582788_i32 = arith.constant 71582788 : i32
    %2 = vector.broadcast %c71582788_i32 : i32 to vector<1x4x256xi32>
    %3 = arith.cmpi slt, %1, %2 : vector<1x4x256xi32>
    %4 = arith.extui %3 : vector<1x4x256xi1> to vector<1x4x256xi32>
    %c0_i32 = arith.constant 0 : i32
    %5 = vector.broadcast %c0_i32 : i32 to vector<1x4x16xi32>
    %6 = vector.extract_strided_slice %4 {offsets = [0, 0, 0], sizes = [1, 4, 240], strides = [1, 1, 1]} : vector<1x4x256xi32> to vector<1x4x240xi32>
    %7 = tpu.concatenate %5, %6 in 2 : vector<1x4x16xi32>, vector<1x4x240xi32> -> vector<1x4x256xi32>
    %8 = arith.ori %4, %7 : vector<1x4x256xi32>
    %c0_i32_5 = arith.constant 0 : i32
    %9 = vector.broadcast %c0_i32_5 : i32 to vector<1x4x16xi32>
    %10 = vector.extract_strided_slice %4 {offsets = [0, 0, 16], sizes = [1, 4, 240], strides = [1, 1, 1]} : vector<1x4x256xi32> to vector<1x4x240xi32>
    %11 = tpu.concatenate %10, %9 in 2 : vector<1x4x240xi32>, vector<1x4x16xi32> -> vector<1x4x256xi32>
    %12 = arith.ori %8, %11 : vector<1x4x256xi32>
    %13 = tpu.iota {dimensions = array<i32: 2>} : vector<1x1x256xi32>
    %c16_i32 = arith.constant 16 : i32
    %c0_i32_6 = arith.constant 0 : i32
    %14 = arith.cmpi eq, %c16_i32, %c0_i32_6 : i32
    %c1_i32 = arith.constant 1 : i32
    %15 = arith.select %14, %c1_i32, %c16_i32 : i32
    %16 = vector.broadcast %15 : i32 to vector<1x1x256xi32>
    %17 = arith.remsi %13, %16 : vector<1x1x256xi32>
    %c0_i32_7 = arith.constant 0 : i32
    %18 = vector.broadcast %c0_i32_7 : i32 to vector<1x1x256xi32>
    %19 = arith.cmpi ne, %17, %18 : vector<1x1x256xi32>
    %c0_i32_8 = arith.constant 0 : i32
    %20 = vector.broadcast %c0_i32_8 : i32 to vector<1x1x256xi32>
    %21 = arith.cmpi slt, %17, %20 : vector<1x1x256xi32>
    %c0_i32_9 = arith.constant 0 : i32
    %22 = arith.cmpi slt, %15, %c0_i32_9 : i32
    %23 = vector.broadcast %22 : i1 to vector<1x1x256xi1>
    %24 = vector.broadcast %23 : vector<1x1x256xi1> to vector<1x1x256xi1>
    %25 = arith.xori %21, %24 : vector<1x1x256xi1>
    %26 = arith.andi %25, %19 : vector<1x1x256xi1>
    %27 = vector.broadcast %15 : i32 to vector<1x1x256xi32>
    %28 = arith.addi %17, %27 : vector<1x1x256xi32>
    %29 = arith.select %26, %28, %17 : vector<1x1x256xi1>, vector<1x1x256xi32>
    %c1_i32_10 = arith.constant 1 : i32
    %30 = vector.broadcast %c1_i32_10 : i32 to vector<1x1x256xi32>
    %31 = arith.cmpi sge, %29, %30 : vector<1x1x256xi32>
    %32 = arith.extui %31 : vector<1x1x256xi1> to vector<1x1x256xi32>
    %c0_i32_11 = arith.constant 0 : i32
    %33 = vector.broadcast %c0_i32_11 : i32 to vector<1x4x1xi32>
    %34 = vector.extract_strided_slice %12 {offsets = [0, 0, 0], sizes = [1, 4, 255], strides = [1, 1, 1]} : vector<1x4x256xi32> to vector<1x4x255xi32>
    %35 = tpu.concatenate %33, %34 in 2 : vector<1x4x1xi32>, vector<1x4x255xi32> -> vector<1x4x256xi32>
    %36 = vector.broadcast %32 : vector<1x1x256xi32> to vector<1x4x256xi32>
    %37 = arith.andi %35, %36 : vector<1x4x256xi32>
    %38 = arith.ori %12, %37 : vector<1x4x256xi32>
    %c15_i32 = arith.constant 15 : i32
    %39 = vector.broadcast %c15_i32 : i32 to vector<1x1x256xi32>
    %40 = arith.cmpi slt, %29, %39 : vector<1x1x256xi32>
    %41 = arith.extui %40 : vector<1x1x256xi1> to vector<1x1x256xi32>
    %c0_i32_12 = arith.constant 0 : i32
    %42 = vector.broadcast %c0_i32_12 : i32 to vector<1x4x1xi32>
    %43 = vector.extract_strided_slice %12 {offsets = [0, 0, 1], sizes = [1, 4, 255], strides = [1, 1, 1]} : vector<1x4x256xi32> to vector<1x4x255xi32>
    %44 = tpu.concatenate %43, %42 in 2 : vector<1x4x255xi32>, vector<1x4x1xi32> -> vector<1x4x256xi32>
    %45 = vector.broadcast %41 : vector<1x1x256xi32> to vector<1x4x256xi32>
    %46 = arith.andi %44, %45 : vector<1x4x256xi32>
    %47 = arith.ori %38, %46 : vector<1x4x256xi32>
    %c0_i32_13 = arith.constant 0 : i32
    %48 = vector.broadcast %c0_i32_13 : i32 to vector<1x4x256xi32>
    %49 = arith.cmpi ne, %47, %48 : vector<1x4x256xi32>
    %cst = arith.constant 0.000000e+00 : f32
    %50 = vector.broadcast %cst : f32 to vector<1x4x256xf32>
    %51 = arith.select %49, %50, %0 : vector<1x4x256xi1>, vector<1x4x256xf32>
    %c0_14 = arith.constant 0 : index
    %c0_15 = arith.constant 0 : index
    %c0_16 = arith.constant 0 : index
    %52 = vector.load %arg4[%c0_14, %c0_15, %c0_16] : memref<1x4x256xf32, #tpu.memory_space<vmem>>, vector<1x4x256xf32>
    tpu.vector_store %arg4[%c0_14, %c0_15, %c0_16], %51 {strides = array<i32>} : memref<1x4x256xf32, #tpu.memory_space<vmem>>, vector<1x4x256xf32>,
    return
  }
  func.func @transform_0(%arg0: i32, %arg1: i32) -> (i32, i32, i32) {
    %c0_i32 = arith.constant 0 : i32
    %c0_i32_0 = arith.constant 0 : i32
    return %arg0, %arg1, %c0_i32 : i32, i32, i32
  }
  func.func @transform_1(%arg0: i32, %arg1: i32) -> (i32, i32, i32) {
    %c0_i32 = arith.constant 0 : i32
    %c0_i32_0 = arith.constant 0 : i32
    return %arg0, %arg1, %c0_i32 : i32, i32, i32
  }
  func.func @transform_2(%arg0: i32, %arg1: i32) -> (i32, i32, i32) {
    %c0_i32 = arith.constant 0 : i32
    %c0_i32_0 = arith.constant 0 : i32
    return %arg0, %arg1, %c0_i32 : i32, i32, i32
  }
}

</mosaic_0001>

<bundles_post_ra>
// kernel: tpu_custom_call.1
= control target key start
LH: loop header
LB: loop body
LE: loop exit
PB: predicated region body
PF: predicated region fallthrough
CT: control target
= control target key end

     0   :  { %7 = vsyncpa [#allocation3], 0  ;;  %s923_s0 = inlined_call_operand.hbm [shape: f32[2,4,256], index: 0, kind: input, shape index: {}]   ;;  %s924_s1 = inlined_call_operand.hbm [shape: s32[2,4,256], index: 1, kind: input, shape index: {}]   ;;  %s925_s2 = inlined_call_operand.hbm [shape: f32[2,4,256], index: 2, kind: output, shape index: {}]  }
   0x1   :  { %9 = vsyncpa [#allocation3 + $0x1], 0 }
   0x2   :  { %10 = vsyncpa [#allocation6], 0 }
   0x3   :  { %12 = vsyncpa [#allocation6 + $0x1], 0 }
   0x4   :  { %13 = vsyncpa [#allocation4], 0 }
   0x5   :  { %15 = vsyncpa [#allocation4 + $0x1], 0  ;;  %s696_s9 = smov 0   ;;  %s698_s10 = smov 0  }
   0x6   :  { %s700_s11 = smov 0   ;;  %s702_s12 = smov 0  }
   0x7   :  { %s704_s13 = smov 0   ;;  %s706_s14 = smov 0  }
   0x8 LB: > { %s431_s15 = sadd.s32 4294967295, %s671_s14   ;;  %s432_s16 = sadd.s32 4294967294, %s671_s14   ;;  %s671_s14 = sphi %s706_s14, %s21_s14   ;;  %s667_s13 = sphi %s704_s13, %s945_s13   ;;  %s663_s12 = sphi %s702_s12, %s944_s12   ;;  %s659_s11 = sphi %s700_s11, %s943_s11   ;;  %s655_s10 = sphi %s698_s10, %s942_s10   ;;  %s651_s9 = sphi %s696_s9, %s941_s9  }
   0x9   : > { %s33_s17 = sadd.s32 1, %s667_s13  ;;  %s42_s18 = sadd.s32 1, %s659_s11 }
   0xa   : > { %p35_p0 = scmp.ge.s32.totalorder %s33_s17, 2  ;;  %p49_p1 = scmp.ne.s32.totalorder %s659_s11, %s655_s10 }
   0xb   : > { %p50_p2 = scmp.eq.s32.totalorder %s671_s14, 0  ;;  %p55_p3 = scmp.ne.s32.totalorder %s655_s10, %s651_s9 }
   0xc   : > { %s947_s17 = smov (%p35_p0, %s33_s17), 0  ;;  %p56_p5 = scmp.eq.s32.totalorder %s431_s15, 0 }
   0xd   : > { %p737_p4 = por %p50_p2, %p49_p1  ;;  %s37_s20 = ssub.s32 %s667_s13, %s947_s17 }
   0xe   : > { %p109_p6 = scmp.eq.s32.totalorder %s431_s15, 1  ;;  %p40_p7 = scmp.eq.s32.totalorder %s37_s20, 0 }
   0xf   : > { %p743_p8 = por %p56_p5, %p55_p3  ;;  %p115_p10 = scmp.eq.s32.totalorder %s432_s16, 1 }
  0x10   : > { %p747_p9 = por %p109_p6, %p49_p1  ;;  %p470_p13 = scmp.lt.s32.totalorder %s671_s14, 2 }
  0x11   : > { %s929_s21 = scalar_select %p743_p8, 1, 0 }
  0x12   : > { %s930_s22 = scalar_select %p747_p9, 1, 0 }
  0x13   : > { %s752_s23 = scalar_select %p40_p7, %s659_s11, %s42_s18  }
  0x14   : > { %p754_p11 = por %p115_p10, %p55_p3  ;;  %s761_s25 = sand.u32 1, %s659_s11  }
  0x15   : > { %s435_s26 = sshll.u32 %s761_s25, 3  ;;  %s450_s27 = sshll.u32 %s667_s13, 7 }
  0x16   : > { %s931_s24 = scalar_select %p754_p11, 1, 0 }
  0x17   : > { %s770_s30 = scalar_lea.hbm %s923_s0, %s450_s27  ;;  %s139_s3 = scalar_lea.vmem [#allocation2], %s435_s26 }
  0x18   : > { %s149_s4 = sshll.u32 %s139_s3, 4  ;;  %p778_p0 = pnand %p470_p13, %p737_p4  ;;  %s774_s4 = int_to_ptr.vmem [resolvable:$true] %s149_s4 }
  0x19   : > { %s136_s6 = scalar_lea.sflag [#allocation3], %s761_s25  ;;  %s525_s7 = scalar_lea.hbm %s770_s30, 128 }
  0x1a   : > { %p526_p3 = scmp.ne.s32.totalorder %s770_s30, %s525_s7  ;;  %p527_p5 = pneg %p778_p0 }
  0x1b   : > { %s530_s16 = scalar_lea.hbm %s923_s0, 256  ;;  %p531_p4 = scmp.lt.u32.totalorder %s770_s30, %s923_s0 }
  0x1c   : > { %p528_p6 = pnand %p527_p5, %p526_p3  ;;  %p532_p10 = scmp.lt.u32.totalorder %s530_s16, %s525_s7 }
  0x1d   : > { %p534_p12 = scmp.lt.u32.totalorder %s525_s7, %s770_s30 }
  0x1e   : > { %p529_p7 = pneg %p528_p6  ;;  %p533_p13 = por %p532_p10, %p531_p4 }
  0x20   : > { %p535_p1 = por %p534_p12, %p533_p13 }
  0x22   : > { %p536_p2 = pnand %p535_p1, %p529_p7 }
  0x24   : > { %539 = shalt.err (!%p536_p2)
}
  0x25   : > { %s540_s20 = scalar_lea.vmem %s774_s4, 128  ;;  %s673_s28 = smov [#allocation2]  }
  0x26   : > { %p541_p3 = scmp.ne.s32.totalorder %s774_s4, %s540_s20  ;;  %s545_s29 = sshll.u32 %s673_s28, 4  ;;  %s546_s29 = int_to_ptr.vmem [resolvable:$false] %s545_s29 }
  0x27   : > { %s547_s3 = scalar_lea.vmem %s546_s29, 256  ;;  %p548_p9 = scmp.lt.s32.totalorder %s774_s4, %s546_s29 }
  0x28   : > { %p543_p6 = pnand %p541_p3, %p527_p5  ;;  %p549_p4 = scmp.lt.s32.totalorder %s547_s3, %s540_s20 }
  0x2a   : > { %p544_p11 = pneg %p543_p6  ;;  %p550_p10 = por %p549_p4, %p548_p9 }
  0x2c   : > { %p551_p12 = pnand %p550_p10, %p544_p11 }
  0x2e   : > { %554 = shalt.err (!%p551_p12)
}
  0x2f   : > { %462 = dma.hbm_to_vmem [thread:$0]  (!%p778_p0), %s770_s30, 128, %s774_s4, %s136_s6  }
  0x30   : > { %p933_p1 = scmp.lt.s32.totalorder %s671_s14, 3  ;;  %p934_p2 = scmp.ge.s32.totalorder %s671_s14, 1 }
  0x31   : > { %s823_s16 = scalar_lea.hbm %s924_s1, %s450_s27  ;;  %s160_s18 = scalar_lea.vmem [#allocation5], %s435_s26 }
  0x32   : > { %p814_p7 = pnand %p934_p2, %p933_p1  ;;  %s170_s19 = sshll.u32 %s160_s18, 4  ;;  %s171_s19 = int_to_ptr.vmem [resolvable:$true] %s170_s19 }
  0x33   : > { %s157_s30 = scalar_lea.sflag [#allocation6], %s761_s25  ;;  %s555_s4 = scalar_lea.hbm %s823_s16, 128 }
  0x34   : > { %s935_s7 = scalar_select %p814_p7, 1, 0 }
  0x35   : > { %p556_p9 = scmp.ne.s32.totalorder %s823_s16, %s555_s4  ;;  %s560_s27 = scalar_lea.hbm %s924_s1, 256 }
  0x36   : > { %p561_p3 = scmp.lt.u32.totalorder %s823_s16, %s924_s1  ;;  %p562_p6 = scmp.lt.u32.totalorder %s560_s27, %s555_s4 }
  0x37   : > { %p558_p11 = pnand %p556_p9, %p527_p5  ;;  %p564_p10 = scmp.lt.u32.totalorder %s555_s4, %s823_s16 }
  0x38   : > { %p563_p4 = por %p562_p6, %p561_p3 }
  0x39   : > { %p559_p13 = pneg %p558_p11 }
  0x3a   : > { %p565_p12 = por %p564_p10, %p563_p4 }
  0x3c   : > { %p566_p1 = pnand %p565_p12, %p559_p13 }
  0x3e   : > { %569 = shalt.err (!%p566_p1)
}
  0x3f   : > { %s570_s25 = scalar_lea.vmem %s171_s19, 128  ;;  %s674_s26 = smov [#allocation5]  }
  0x40   : > { %p571_p2 = scmp.ne.s32.totalorder %s171_s19, %s570_s25  ;;  %s575_s3 = sshll.u32 %s674_s26, 4  ;;  %s576_s3 = int_to_ptr.vmem [resolvable:$false] %s575_s3 }
  0x41   : > { %s577_s8 = scalar_lea.vmem %s576_s3, 256  ;;  %p578_p8 = scmp.lt.s32.totalorder %s171_s19, %s576_s3 }
  0x42   : > { %p573_p9 = pnand %p571_p2, %p527_p5  ;;  %p579_p7 = scmp.lt.s32.totalorder %s577_s8, %s570_s25 }
  0x44   : > { %p574_p11 = pneg %p573_p9  ;;  %p580_p3 = por %p579_p7, %p578_p8 }
  0x46   : > { %p581_p6 = pnand %p580_p3, %p574_p11 }
  0x48   : > { %584 = shalt.err (!%p581_p6)
}
  0x49   : > { %465 = dma.hbm_to_vmem [thread:$0]  (!%p778_p0), %s823_s16, 128, %s171_s19, %s157_s30  }
  0x4a   : > { %p936_p13 = scmp.ne.s32.totalorder %s935_s7, 0 }
  0x4b   : > { %s850_s15 = sand.u32 (!%p936_p13), 1, %s655_s10   ;;  %p937_p8 = scmp.ne.s32.totalorder (!%p936_p13), %s929_s21, 0 }
  0x4c   : > { %179 = sbr.rel (%p936_p13) target bundleno = 359 (0x167), region = 28  ;;  %s853_s18 = sshll.u32 (!%p936_p13), %s850_s15, 3 }
  0x4d   : > { %s182_s4 = scalar_lea.sflag (!%p936_p13), [#allocation3], %s850_s15  ;;  %s185_s6 = scalar_lea.vmem (!%p936_p13), [#allocation2], %s853_s18 }
  0x53   : > { %638 = dma.done.wait (%p937_p8), %s182_s4, 128  }
  0x54   : > { %640 = vsyncadd (%p937_p8), %s182_s4, 4294967168  ;;  %s191_s5 = scalar_lea.sflag [#allocation6], %s850_s15  ;;  %s194_s7 = scalar_lea.vmem [#allocation5], %s853_s18 }
  0x55   : > { %642 = dma.done.wait (%p937_p8), %s191_s5, 128  }
  0x56   : > { %644 = vsyncadd (%p937_p8), %s191_s5, 4294967168  ;;  %v221_v0 = vld [vmem:[%s194_s7] sm:$0xff]  ;;  %v675_v1 = vmov 0   ;;  %s676_s16 = smov 112   ;;  %s677_s19 = smov 16   ;;  %vm229_vm1 = vcmask 130048   ;;  %v243_v17 = vlaneseq }
  0x57   : > { %vm222_vm0 = vcmp.lt.s32.totalorder %v221_v0, 71582788  ;;  %vm238_vm2 = vcmask 916480   ;;  %s678_s21 = smov 1   ;;  %s679_s30 = smov 127   ;;  %vm279_vm4 = vcmask 7168  }
  0x58   : > { %v223_v2 = vsel %vm222_vm0, 1, %v675_v1  ;;  %v244_v18 = vand.u32 127, %v243_v17  ;;  %vm294_vm8 = vcmask 1039360   ;;  %s452_s20 = sshll.u32 %s663_s12, 7  ;;  %s219_s27 = scalar_lea.vmem [#allocation7], %s853_s18  ;;  %v220_v41 = vld [vmem:[%s185_s6] sm:$0xff] }
  0x59   : > { %234 = vrot.lane.b32.xlu1 %v223_v2, %s676_s16  ;;  %225 = vrot.lane.b32.xlu0 %v223_v2, %s677_s19  ;;  %v224_v3 = vcombine.high %v223_v2, %v223_v2  ;;  %s321_s28 = sshll.u32 %s219_s27, 4  ;;  %s874_s26 = scalar_lea.hbm %s925_s2, %s452_s20  ;;  %s876_s28 = int_to_ptr.vmem [resolvable:$true] %s321_s28 }
  0x5a   : > { %v245_v19 = vadd.s32 128, %v244_v18  ;;  %v250_v20 = vand.u32 15, %v244_v18  ;;  %s305_s3 = scalar_lea.sflag [#allocation4], %s850_s15  ;;  %s585_s12 = scalar_lea.vmem %s876_s28, 128 }
  0x5b   : > { %p586_p0 = scmp.ne.s32.totalorder %s876_s28, %s585_s12  ;;  %p938_p5 = scmp.ne.s32.totalorder %s930_s22, 0 }
  0x5c   : > { %v257_v21 = vand.u32 15, %v245_v19  ;;  %vm270_vm3 = vcmp.ge.s32.totalorder %v250_v20, 1  ;;  %vm286_vm6 = vcmp.lt.s32.totalorder %v250_v20, 15  ;;  %s680_s8 = smov [#allocation7]  }
  0x5d   : > { %236 = vrot.lane.b32.xlu1 %v224_v3, %s676_s16  ;;  %227 = vrot.lane.b32.xlu0 %v224_v3, %s677_s19  ;;  %v272_v23 = vsel %vm270_vm3, 1, %v675_v1  ;;  %v288_v30 = vsel %vm286_vm6, 1, %v675_v1  ;;  %p587_p7 = pnand %p586_p0, %p938_p5  ;;  %s589_s18 = sshll.u32 %s680_s8, 4  ;;  %s590_s18 = int_to_ptr.vmem [resolvable:$false] %s589_s18 }
  0x5e   : > { %vm271_vm5 = vcmp.ge.s32.totalorder %v257_v21, 1  ;;  %vm287_vm7 = vcmp.lt.s32.totalorder %v257_v21, 15  ;;  %s591_s4 = scalar_lea.vmem %s590_s18, 256  ;;  %p592_p10 = scmp.lt.s32.totalorder %s876_s28, %s590_s18 }
  0x5f   : > { %v273_v25 = vsel %vm271_vm5, 1, %v675_v1  ;;  %v289_v31 = vsel %vm287_vm7, 1, %v675_v1  ;;  %p588_p4 = pneg %p587_p7  ;;  %p593_p12 = scmp.lt.s32.totalorder %s591_s4, %s585_s12 }
  0x61   : > { %p594_p1 = por %p593_p12, %p592_p10 }
  0x63   : > { %p595_p2 = pnand %p594_p1, %p588_p4 }
  0xcb   : > { %v235_v4 = vpop.permute.xlu1 %234  ;;  %v226_v5 = vpop.permute.xlu0 %225 }
  0xcc   : > { %v231_v8 = vsel %vm229_vm1, 0, %v226_v5 }
  0xcf   : > { %v237_v6 = vpop.permute.xlu1 %236  ;;  %v228_v7 = vpop.permute.xlu0 %227 }
  0xd0   : > { %v239_v9 = vsel %vm238_vm2, %v235_v4, %v237_v6  ;;  %v240_v10 = vsel %vm238_vm2, %v237_v6, 0  ;;  %v230_v11 = vsel %vm229_vm1, %v226_v5, %v228_v7 }
  0xd1   : > { %v232_v12 = vcombine.low %v231_v8, %v230_v11  ;;  %v241_v13 = vcombine.low %v239_v9, %v240_v10 }
  0xd3   : > { %v233_v14 = vor.u32 %v232_v12, %v223_v2 }
  0xd5   : > { %v242_v15 = vor.u32 %v241_v13, %v233_v14 }
  0xd7   : > { %275 = vrot.lane.b32.xlu0 %v242_v15, %s678_s21  ;;  %v274_v16 = vcombine.high %v242_v15, %v242_v15 }
  0xd9   : > { %277 = vrot.lane.b32.xlu1 %v274_v16, %s678_s21 }
  0xdb   : > { %290 = vrot.lane.b32.xlu0 %v242_v15, %s679_s30 }
  0xdd   : > { %292 = vrot.lane.b32.xlu1 %v274_v16, %s679_s30 }
 0x149   : > { %v276_v22 = vpop.permute.xlu0 %275 }
 0x14a   : > { %v281_v24 = vsel %vm279_vm4, 0, %v276_v22 }
 0x14b   : > { %v278_v26 = vpop.permute.xlu1 %277  ;;  %v282_v28 = vand.u32 %v281_v24, %v272_v23 }
 0x14c   : > { %v280_v27 = vsel %vm279_vm4, %v276_v22, %v278_v26 }
 0x14d   : > { %v283_v29 = vand.u32 %v280_v27, %v273_v25  ;;  %v291_v33 = vpop.permute.xlu0 %290 }
 0x14f   : > { %v284_v32 = vcombine.low %v282_v28, %v283_v29  ;;  %v293_v34 = vpop.permute.xlu1 %292 }
 0x150   : > { %v295_v35 = vsel %vm294_vm8, %v291_v33, %v293_v34  ;;  %v296_v36 = vsel %vm294_vm8, %v293_v34, 0 }
 0x151   : > { %v297_v37 = vand.u32 %v295_v35, %v288_v30  ;;  %v298_v38 = vand.u32 %v296_v36, %v289_v31  ;;  %v285_v39 = vor.u32 %v284_v32, %v242_v15 }
 0x153   : > { %v299_v40 = vcombine.low %v297_v37, %v298_v38 }
 0x155   : > { %v300_v42 = vor.u32 %v299_v40, %v285_v39 }
 0x157   : > { %vm301_vm9 = vcmp.ne.s32.totalorder %v300_v42, 0 }
 0x158   : > { %v302_v43 = vsel %vm301_vm9, 0.0, %v220_v41 }
 0x159   : > { %303 = vst [vmem:[%s219_s27] sm:$0xff] %v302_v43 }
 0x15a   : > { %598 = shalt.err (!%p595_p2)
}
 0x15b   : > { %s599_s15 = scalar_lea.hbm %s874_s26, 128  ;;  %s603_s7 = scalar_lea.hbm %s925_s2, 256 }
 0x15c   : > { %p600_p9 = scmp.ne.s32.totalorder %s874_s26, %s599_s15  ;;  %p604_p6 = scmp.lt.u32.totalorder %s874_s26, %s925_s2 }
 0x15d   : > { %p605_p13 = scmp.lt.u32.totalorder %s603_s7, %s599_s15  ;;  %p607_p0 = scmp.lt.u32.totalorder %s599_s15, %s874_s26 }
 0x15e   : > { %p601_p11 = pnand %p600_p9, %p938_p5 }
 0x15f   : > { %p606_p8 = por %p605_p13, %p604_p6 }
 0x160   : > { %p602_p3 = pneg %p601_p11 }
 0x161   : > { %p608_p7 = por %p607_p0, %p606_p8 }
 0x163   : > { %p609_p4 = pnand %p608_p7, %p602_p3 }
 0x165   : > { %612 = shalt.err (!%p609_p4)
}
 0x166   : > { %457 = dma.vmem_to_hbm [thread:$0]  (%p938_p5), %s876_s28, 128, %s874_s26, %s305_s3  }
 0x167 PF: > { %s333_s21 = sand.u32 1, %s651_s9   ;;  %p939_p10 = scmp.ne.s32.totalorder %s931_s24, 0 }
 0x168   : > { %p940_p12 = scmp.ge.s32.totalorder %s671_s14, 2  ;;  %s334_s30 = scalar_lea.sflag [#allocation4], %s333_s21 }
 0x16a   : > { %p467_p1 = pnand %p940_p12, %p939_p10 }
 0x16c   : > { %646 = dma.done.wait (!%p467_p1), %s334_s30, 128  }
 0x16d   : > { %648 = vsyncadd (!%p467_p1), %s334_s30, 4294967168  ;;  %s21_s14 = sadd.s32 1, %s671_s14   ;;  %s941_s9 = smov %s655_s10 }
 0x16e   : > { %p18_p2 = scmp.ge.s32.totalorder %s21_s14, 4   ;;  %s942_s10 = smov %s659_s11 }
 0x16f   : > { %s943_s11 = smov %s752_s23  ;;  %s944_s12 = smov %s667_s13 }
 0x170   : > { %s945_s13 = smov %s947_s17  ;;  %20 = sbr.rel (!%p18_p2) target bundleno = 8 (0x8), region = 86 }
 0x177   :  { %339 = vsyncpa [#allocation3], 1 }
 0x178   :  { %341 = vsyncpa [#allocation3 + $0x1], 1 }
 0x179   :  { %342 = vsyncpa [#allocation6], 1 }
 0x17a   :  { %344 = vsyncpa [#allocation6 + $0x1], 1 }
 0x17b   :  { %345 = vsyncpa [#allocation4], 1 }
 0x17c   :  { %347 = vsyncpa [#allocation4 + $0x1], 1 }

</bundles_post_ra>
